<compile_context>
chip_gen: v7x
topology: tpu7x:2x2x1
jax: 0.10.0
libtpu: 0.0.40
codegen_flags: <defaults>
</compile_context>

<pallas_src>
import functools
from types import SimpleNamespace

import jax
import jax.numpy as jnp
from jax.experimental import pallas as pl
from jax.experimental.pallas import tpu as pltpu


def _round_up(x, m):
    return ((x + m - 1) // m) * m


# ----------------------------- Pallas kernel -------------------------------

def _critic_fused_kernel(states_ref, pooled_ref, proj_ref, w1p_ref, b1_ref,
                         w2_ref, b2_ref, w3_ref, b3_ref, o_ref,
                         *, node_rows, use_pooled):
    """values = L3(relu(L2(relu(onehot(states) @ proj + pooled @ W1p + b1)))).

    `proj` is the embedding tables pre-multiplied by their layer-1 weight
    slabs and stacked (node slot 0, node slot 1, ..., time), so one one-hot
    matmul implements gather + concat + linear1 for the embedding part.
    """
    tb, n_cols = states_ref.shape          # n_cols = defender_num + 2
    r_pad = proj_ref.shape[0]              # stacked-table rows (lane padded)

    st = states_ref[...]                   # (tb, n_cols) int32
    # Row offset of column j in the stacked table is j * node_rows
    # (time block starts right after the n_slots node blocks).
    col = jax.lax.broadcasted_iota(jnp.int32, (tb, n_cols), 1)
    idx = st + col * node_rows             # stacked-table row ids

    # Multi-hot selection matrix: exactly one 1 per (row, column-slot).
    lane = jax.lax.broadcasted_iota(jnp.int32, (tb, r_pad), 1)
    oh = jnp.zeros((tb, r_pad), jnp.float32)
    for j in range(n_cols):                # static unroll; n_cols is tiny
        oh = oh + (idx[:, j:j + 1] == lane).astype(jnp.float32)

    # ---- layer 1 (gather + concat + linear1 in one MXU matmul) ----
    h1 = jnp.dot(oh, proj_ref[...], preferred_element_type=jnp.float32)
    if use_pooled:                         # static (trace-time) branch
        h1 = h1 + jnp.dot(pooled_ref[...], w1p_ref[...],
                          preferred_element_type=jnp.float32)
    h1 = jnp.maximum(h1 + b1_ref[...], 0.0)

    # ---- layer 2 ----
    h2 = jnp.dot(h1, w2_ref[...], preferred_element_type=jnp.float32) + b2_ref[...]
    h2 = jnp.maximum(h2, 0.0)

    # ---- layer 3 (output width 1): VPU mul + lane reduction, no MXU push ----
    v = jnp.sum(h2 * w3_ref[...], axis=-1, keepdims=True) + b3_ref[...]
    o_ref[...] = v.astype(o_ref.dtype)


# ------------------------------- wrapper ------------------------------------

def critic_forward_pallas(states, pooled, node_tab, time_tab,
                          w1, b1, w2, b2, w3, b3, *,
                          use_augmentation, block_rows=512):
    """Fused embedding-lookup + 3-layer-MLP critic forward.

    states : int32 [B, defender_num + 2]   (last column = time index)
    pooled : f32   [B, gnn_output_dim]     (ignored if not use_augmentation)
    returns: f32   [B, 1]
    """
    B, S = states.shape
    n_slots = S - 1
    E = node_tab.shape[1]
    H = w2.shape[0]
    node_rows = node_tab.shape[0]
    time_rows = time_tab.shape[0]

    # Fold the embedding tables through the layer-1 weight slabs once per call
    # (weight-only matmuls over tiny tables), then stack:
    #   proj[j*node_rows + r] = node_tab[r] @ W1[j*E:(j+1)*E]
    #   proj[n_slots*node_rows + t] = time_tab[t] @ W1[n_slots*E:(n_slots+1)*E]
    w1_nodes = w1[:n_slots * E].reshape(n_slots, E, H)
    w1_time = w1[n_slots * E:(n_slots + 1) * E]
    proj_nodes = jnp.einsum('re,seh->srh', node_tab, w1_nodes)
    proj_time = jnp.dot(time_tab, w1_time)
    proj = jnp.concatenate(
        [proj_nodes.reshape(n_slots * node_rows, H), proj_time], axis=0)
    r_tot = n_slots * node_rows + time_rows
    r_pad = max(128, _round_up(r_tot, 128))      # lane-dense contraction dim
    proj = jnp.pad(proj, ((0, r_pad - r_tot), (0, 0)))

    if use_augmentation:
        w1_pool = w1[(n_slots + 1) * E:]
        pooled_in = pooled
    else:
        # Dummy (never read: kernel takes the static use_pooled=False branch).
        w1_pool = jnp.zeros((1, H), jnp.float32)
        pooled_in = jnp.zeros((B, 1), jnp.float32)
    w3_row = w3.reshape(1, H)

    # Batch tiling: sublane-aligned tile; weights/tables stay VMEM-resident.
    tb = min(block_rows, _round_up(B, 8))
    b_pad = _round_up(B, tb)
    if b_pad != B:
        states = jnp.pad(states, ((0, b_pad - B), (0, 0)))
        pooled_in = jnp.pad(pooled_in, ((0, b_pad - B), (0, 0)))
    grid = (b_pad // tb,)

    def tile_spec(cols):
        return pl.BlockSpec((tb, cols), lambda i: (i, 0))

    def resident(shape):
        nd = len(shape)
        return pl.BlockSpec(tuple(shape), lambda i, _nd=nd: (0,) * _nd)

    kernel = functools.partial(_critic_fused_kernel,
                               node_rows=node_rows,
                               use_pooled=use_augmentation)

    out = pl.pallas_call(
        kernel,
        out_shape=jax.ShapeDtypeStruct((b_pad, 1), jnp.float32),
        grid=grid,
        in_specs=[
            tile_spec(S),                       # states (int32)
            tile_spec(pooled_in.shape[1]),      # pooled
            resident(proj.shape),               # stacked emb @ W1 table
            resident(w1_pool.shape),
            resident(b1.shape),
            resident(w2.shape),
            resident(b2.shape),
            resident(w3_row.shape),
            resident(b3.shape),
        ],
        out_specs=pl.BlockSpec((tb, 1), lambda i: (i, 0)),
        compiler_params=pltpu.CompilerParams(
            dimension_semantics=("parallel",)),
    )(states, pooled_in, proj, w1_pool, b1, w2, b2, w3_row, b3)
    return out[:B]


# --------------------------- Module in JAX + Pallas -------------------------

class RCriticWithEmbLayerPallas:
    def __init__(self, args, node_num, defender_num, key):
        self.args = args
        self.node_num = node_num
        self.defender_num = defender_num

        E = args.state_emb_dim
        H = args.hidden_size
        if args.use_augmentation:
            d_in = E * (defender_num + 2) + args.gnn_output_dim
        else:
            d_in = E * (defender_num + 2)
        self.value_input_dim = d_in

        ks = jax.random.split(key, 8)

        # Embedding tables (deterministic synthetic init).
        self.node_emb = jax.random.normal(ks[0], (node_num + 1, E), jnp.float32)
        self.time_emb = jax.random.normal(
            ks[1], (args.max_time_horizon_for_state_emb, E), jnp.float32)

        # Linear layers, kaiming-uniform-like deterministic init, stored as
        # [in, out] (transpose of PyTorch's Linear.weight).
        def kaiming_uniform(k, fan_in, fan_out):
            bound = jnp.sqrt(6.0 / fan_in)
            return jax.random.uniform(k, (fan_in, fan_out), jnp.float32,
                                      -bound, bound)

        self.w1 = kaiming_uniform(ks[2], d_in, H)
        self.b1 = jax.random.uniform(ks[3], (1, H), jnp.float32, -0.1, 0.1)
        self.w2 = kaiming_uniform(ks[4], H, H)
        self.b2 = jax.random.uniform(ks[5], (1, H), jnp.float32, -0.1, 0.1)
        self.w3 = kaiming_uniform(ks[6], H, 1)
        self.b3 = jax.random.uniform(ks[7], (1, 1), jnp.float32, -0.1, 0.1)

    @functools.partial(jax.jit, static_argnums=(0, 3))
    def forward(self, states, pooled_node_embs, batch=True):
        # states: int32 [B, defender_num + 2]  (last column = time index)
        # pooled_node_embs: float32 [B, gnn_output_dim]
        if not batch:
            states = states[None, :]
        return critic_forward_pallas(
            states, pooled_node_embs,
            self.node_emb, self.time_emb,
            self.w1, self.b1, self.w2, self.b2, self.w3, self.b3,
            use_augmentation=self.args.use_augmentation)


# --------------------------------- main -------------------------------------

if __name__ == "__main__":
    args = SimpleNamespace(
        hidden_size=32,
        state_emb_dim=4,
        gnn_output_dim=8,
        max_time_horizon_for_state_emb=10,
        use_augmentation=True,
    )
    node_num = 16
    defender_num = 2
    B = 8

    key = jax.random.PRNGKey(0)
    k_model, k_states, k_time, k_pool = jax.random.split(key, 4)

    model = RCriticWithEmbLayerPallas(args, node_num, defender_num, k_model)

    node_cols = jax.random.randint(
        k_states, (B, defender_num + 1), 0, node_num + 1, dtype=jnp.int32)
    time_col = jax.random.randint(
        k_time, (B, 1), 0, args.max_time_horizon_for_state_emb, dtype=jnp.int32)
    states = jnp.concatenate([node_cols, time_col], axis=1)
    pooled_node_embs = jax.random.normal(
        k_pool, (B, args.gnn_output_dim), jnp.float32)

    values = model.forward(states, pooled_node_embs, True)
    values = jax.block_until_ready(values)

    # Pure-JAX reference for sanity check.
    node_idx_emb = jnp.take(model.node_emb, states[:, :-1], axis=0).reshape(B, -1)
    time_idx_emb = jnp.take(model.time_emb, states[:, -1], axis=0)
    se = jnp.concatenate([node_idx_emb, time_idx_emb, pooled_node_embs], axis=1)
    h = jnp.maximum(se @ model.w1 + model.b1, 0.0)
    h = jnp.maximum(h @ model.w2 + model.b2, 0.0)
    ref = h @ model.w3 + model.b3

    assert values.shape == (B, 1), values.shape
    assert jnp.allclose(values, ref, atol=1e-4, rtol=1e-4), (
        jnp.max(jnp.abs(values - ref)))

    print("KERNEL_OK")
</pallas_src>

<mosaic_0001>
module attributes {stable_mosaic.version = 11 : i64} {
  func.func @_critic_fused_kernel(%arg0: i32, %arg1: memref<8x4xi32, #tpu.memory_space<vmem>>, %arg2: memref<8x8xf32, #tpu.memory_space<vmem>>, %arg3: memref<128x32xf32, #tpu.memory_space<vmem>>, %arg4: memref<8x32xf32, #tpu.memory_space<vmem>>, %arg5: memref<1x32xf32, #tpu.memory_space<vmem>>, %arg6: memref<32x32xf32, #tpu.memory_space<vmem>>, %arg7: memref<1x32xf32, #tpu.memory_space<vmem>>, %arg8: memref<1x32xf32, #tpu.memory_space<vmem>>, %arg9: memref<1x1xf32, #tpu.memory_space<vmem>>, %arg10: memref<8x1xf32, #tpu.memory_space<vmem>>) attributes {dimension_semantics = [#tpu.dimension_semantics<parallel>], iteration_bounds = array<i64: 1>, scalar_prefetch = 0 : i64, scratch_operands = 0 : i64, tpu.core_type = #tpu.core_type<tc>, window_params = [{transform_indices = @transform_0, window_bounds = array<i64: 8, 4>}, {transform_indices = @transform_1, window_bounds = array<i64: 8, 8>}, {pipeline_mode = #tpu.pipeline_mode<synchronous>, transform_indices = @transform_2, window_bounds = array<i64: 128, 32>}, {pipeline_mode = #tpu.pipeline_mode<synchronous>, transform_indices = @transform_3, window_bounds = array<i64: 8, 32>}, {pipeline_mode = #tpu.pipeline_mode<synchronous>, transform_indices = @transform_4, window_bounds = array<i64: 1, 32>}, {pipeline_mode = #tpu.pipeline_mode<synchronous>, transform_indices = @transform_5, window_bounds = array<i64: 32, 32>}, {pipeline_mode = #tpu.pipeline_mode<synchronous>, transform_indices = @transform_6, window_bounds = array<i64: 1, 32>}, {pipeline_mode = #tpu.pipeline_mode<synchronous>, transform_indices = @transform_7, window_bounds = array<i64: 1, 32>}, {pipeline_mode = #tpu.pipeline_mode<synchronous>, transform_indices = @transform_8, window_bounds = array<i64: 1, 1>}, {transform_indices = @transform_9, window_bounds = array<i64: 8, 1>}]} {
    %c0 = arith.constant 0 : index
    %c0_0 = arith.constant 0 : index
    %0 = vector.load %arg1[%c0, %c0_0] : memref<8x4xi32, #tpu.memory_space<vmem>>, vector<8x4xi32>
    %1 = tpu.iota {dimensions = array<i32: 1>} : vector<8x4xi32>
    %c17_i32 = arith.constant 17 : i32
    %2 = vector.broadcast %c17_i32 : i32 to vector<8x4xi32>
    %3 = arith.muli %1, %2 : vector<8x4xi32>
    %4 = arith.addi %0, %3 : vector<8x4xi32>
    %5 = tpu.iota {dimensions = array<i32: 1>} : vector<8x128xi32>
    %cst = arith.constant 0.000000e+00 : f32
    %6 = vector.broadcast %cst : f32 to vector<8x128xf32>
    %7 = vector.extract_strided_slice %4 {offsets = [0, 0], sizes = [8, 1], strides = [1, 1]} : vector<8x4xi32> to vector<8x1xi32>
    %8 = vector.broadcast %7 : vector<8x1xi32> to vector<8x128xi32>
    %9 = arith.cmpi eq, %8, %5 : vector<8x128xi32>
    %10 = arith.extui %9 : vector<8x128xi1> to vector<8x128xi32>
    %11 = arith.sitofp %10 : vector<8x128xi32> to vector<8x128xf32>
    %12 = arith.addf %6, %11 : vector<8x128xf32>
    %13 = vector.extract_strided_slice %4 {offsets = [0, 1], sizes = [8, 1], strides = [1, 1]} : vector<8x4xi32> to vector<8x1xi32>
    %14 = vector.broadcast %13 : vector<8x1xi32> to vector<8x128xi32>
    %15 = arith.cmpi eq, %14, %5 : vector<8x128xi32>
    %16 = arith.extui %15 : vector<8x128xi1> to vector<8x128xi32>
    %17 = arith.sitofp %16 : vector<8x128xi32> to vector<8x128xf32>
    %18 = arith.addf %12, %17 : vector<8x128xf32>
    %19 = vector.extract_strided_slice %4 {offsets = [0, 2], sizes = [8, 1], strides = [1, 1]} : vector<8x4xi32> to vector<8x1xi32>
    %20 = vector.broadcast %19 : vector<8x1xi32> to vector<8x128xi32>
    %21 = arith.cmpi eq, %20, %5 : vector<8x128xi32>
    %22 = arith.extui %21 : vector<8x128xi1> to vector<8x128xi32>
    %23 = arith.sitofp %22 : vector<8x128xi32> to vector<8x128xf32>
    %24 = arith.addf %18, %23 : vector<8x128xf32>
    %25 = vector.extract_strided_slice %4 {offsets = [0, 3], sizes = [8, 1], strides = [1, 1]} : vector<8x4xi32> to vector<8x1xi32>
    %26 = vector.broadcast %25 : vector<8x1xi32> to vector<8x128xi32>
    %27 = arith.cmpi eq, %26, %5 : vector<8x128xi32>
    %28 = arith.extui %27 : vector<8x128xi1> to vector<8x128xi32>
    %29 = arith.sitofp %28 : vector<8x128xi32> to vector<8x128xf32>
    %30 = arith.addf %24, %29 : vector<8x128xf32>
    %c0_1 = arith.constant 0 : index
    %c0_2 = arith.constant 0 : index
    %31 = vector.load %arg3[%c0_1, %c0_2] : memref<128x32xf32, #tpu.memory_space<vmem>>, vector<128x32xf32>
    %cst_3 = arith.constant dense<0.000000e+00> : vector<8x32xf32>
    %32 = tpu.matmul %30, %31, %cst_3 {dimension_numbers = #tpu.dot_dimension_numbers<[1], [0], [0], [1], [0, 0, 1, 1], [], []>} : vector<8x128xf32>, vector<128x32xf32>, vector<8x32xf32> -> vector<8x32xf32>
    %c0_4 = arith.constant 0 : index
    %c0_5 = arith.constant 0 : index
    %33 = vector.load %arg2[%c0_4, %c0_5] : memref<8x8xf32, #tpu.memory_space<vmem>>, vector<8x8xf32>
    %c0_6 = arith.constant 0 : index
    %c0_7 = arith.constant 0 : index
    %34 = vector.load %arg4[%c0_6, %c0_7] : memref<8x32xf32, #tpu.memory_space<vmem>>, vector<8x32xf32>
    %cst_8 = arith.constant dense<0.000000e+00> : vector<8x32xf32>
    %35 = tpu.matmul %33, %34, %cst_8 {dimension_numbers = #tpu.dot_dimension_numbers<[1], [0], [0], [1], [0, 0, 1, 1], [], []>} : vector<8x8xf32>, vector<8x32xf32>, vector<8x32xf32> -> vector<8x32xf32>
    %36 = arith.addf %32, %35 : vector<8x32xf32>
    %c0_9 = arith.constant 0 : index
    %c0_10 = arith.constant 0 : index
    %37 = vector.load %arg5[%c0_9, %c0_10] : memref<1x32xf32, #tpu.memory_space<vmem>>, vector<1x32xf32>
    %38 = vector.broadcast %37 : vector<1x32xf32> to vector<8x32xf32>
    %39 = arith.addf %36, %38 : vector<8x32xf32>
    %cst_11 = arith.constant 0.000000e+00 : f32
    %40 = vector.broadcast %cst_11 : f32 to vector<8x32xf32>
    %41 = arith.maximumf %39, %40 : vector<8x32xf32>
    %c0_12 = arith.constant 0 : index
    %c0_13 = arith.constant 0 : index
    %42 = vector.load %arg6[%c0_12, %c0_13] : memref<32x32xf32, #tpu.memory_space<vmem>>, vector<32x32xf32>
    %cst_14 = arith.constant dense<0.000000e+00> : vector<8x32xf32>
    %43 = tpu.matmul %41, %42, %cst_14 {dimension_numbers = #tpu.dot_dimension_numbers<[1], [0], [0], [1], [0, 0, 1, 1], [], []>} : vector<8x32xf32>, vector<32x32xf32>, vector<8x32xf32> -> vector<8x32xf32>
    %c0_15 = arith.constant 0 : index
    %c0_16 = arith.constant 0 : index
    %44 = vector.load %arg7[%c0_15, %c0_16] : memref<1x32xf32, #tpu.memory_space<vmem>>, vector<1x32xf32>
    %45 = vector.broadcast %44 : vector<1x32xf32> to vector<8x32xf32>
    %46 = arith.addf %43, %45 : vector<8x32xf32>
    %cst_17 = arith.constant 0.000000e+00 : f32
    %47 = vector.broadcast %cst_17 : f32 to vector<8x32xf32>
    %48 = arith.maximumf %46, %47 : vector<8x32xf32>
    %c0_18 = arith.constant 0 : index
    %c0_19 = arith.constant 0 : index
    %49 = vector.load %arg8[%c0_18, %c0_19] : memref<1x32xf32, #tpu.memory_space<vmem>>, vector<1x32xf32>
    %50 = vector.broadcast %49 : vector<1x32xf32> to vector<8x32xf32>
    %51 = arith.mulf %48, %50 : vector<8x32xf32>
    %cst_20 = arith.constant dense<0.000000e+00> : vector<8xf32>
    %52 = vector.multi_reduction <add>, %51, %cst_20 [1] : vector<8x32xf32> to vector<8xf32>
    %53 = vector.shape_cast %52 : vector<8xf32> to vector<8x1xf32>
    %c0_21 = arith.constant 0 : index
    %c0_22 = arith.constant 0 : index
    %54 = vector.load %arg9[%c0_21, %c0_22] : memref<1x1xf32, #tpu.memory_space<vmem>>, vector<1x1xf32>
    %55 = vector.broadcast %54 : vector<1x1xf32> to vector<8x1xf32>
    %56 = arith.addf %53, %55 : vector<8x1xf32>
    %c0_23 = arith.constant 0 : index
    %c0_24 = arith.constant 0 : index
    %57 = vector.load %arg10[%c0_23, %c0_24] : memref<8x1xf32, #tpu.memory_space<vmem>>, vector<8x1xf32>
    tpu.vector_store %arg10[%c0_23, %c0_24], %56 {strides = array<i32>} : memref<8x1xf32, #tpu.memory_space<vmem>>, vector<8x1xf32>,
    return
  }
  func.func @transform_0(%arg0: i32) -> (i32, i32) {
    %c0_i32 = arith.constant 0 : i32
    %c0_i32_0 = arith.constant 0 : i32
    return %arg0, %c0_i32 : i32, i32
  }
  func.func @transform_1(%arg0: i32) -> (i32, i32) {
    %c0_i32 = arith.constant 0 : i32
    %c0_i32_0 = arith.constant 0 : i32
    return %arg0, %c0_i32 : i32, i32
  }
  func.func @transform_2(%arg0: i32) -> (i32, i32) {
    %c0_i32 = arith.constant 0 : i32
    %c0_i32_0 = arith.constant 0 : i32
    %c0_i32_1 = arith.constant 0 : i32
    return %c0_i32, %c0_i32_0 : i32, i32
  }
  func.func @transform_3(%arg0: i32) -> (i32, i32) {
    %c0_i32 = arith.constant 0 : i32
    %c0_i32_0 = arith.constant 0 : i32
    %c0_i32_1 = arith.constant 0 : i32
    return %c0_i32, %c0_i32_0 : i32, i32
  }
  func.func @transform_4(%arg0: i32) -> (i32, i32) {
    %c0_i32 = arith.constant 0 : i32
    %c0_i32_0 = arith.constant 0 : i32
    %c0_i32_1 = arith.constant 0 : i32
    return %c0_i32, %c0_i32_0 : i32, i32
  }
  func.func @transform_5(%arg0: i32) -> (i32, i32) {
    %c0_i32 = arith.constant 0 : i32
    %c0_i32_0 = arith.constant 0 : i32
    %c0_i32_1 = arith.constant 0 : i32
    return %c0_i32, %c0_i32_0 : i32, i32
  }
  func.func @transform_6(%arg0: i32) -> (i32, i32) {
    %c0_i32 = arith.constant 0 : i32
    %c0_i32_0 = arith.constant 0 : i32
    %c0_i32_1 = arith.constant 0 : i32
    return %c0_i32, %c0_i32_0 : i32, i32
  }
  func.func @transform_7(%arg0: i32) -> (i32, i32) {
    %c0_i32 = arith.constant 0 : i32
    %c0_i32_0 = arith.constant 0 : i32
    %c0_i32_1 = arith.constant 0 : i32
    return %c0_i32, %c0_i32_0 : i32, i32
  }
  func.func @transform_8(%arg0: i32) -> (i32, i32) {
    %c0_i32 = arith.constant 0 : i32
    %c0_i32_0 = arith.constant 0 : i32
    %c0_i32_1 = arith.constant 0 : i32
    return %c0_i32, %c0_i32_0 : i32, i32
  }
  func.func @transform_9(%arg0: i32) -> (i32, i32) {
    %c0_i32 = arith.constant 0 : i32
    %c0_i32_0 = arith.constant 0 : i32
    return %arg0, %c0_i32 : i32, i32
  }
}

</mosaic_0001>

<bundles_post_ra>
// kernel: forward.1
= control target key start
LH: loop header
LB: loop body
LE: loop exit
PB: predicated region body
PF: predicated region fallthrough
CT: control target
= control target key end

     0   :  { %s692_s0 = inlined_call_operand.vmem [shape: s32[8,4], index: 0, kind: input, shape index: {}]   ;;  %s693_s1 = inlined_call_operand.vmem [shape: f32[8,8], index: 1, kind: input, shape index: {}]   ;;  %s694_s2 = inlined_call_operand.hbm [shape: f32[128,32], index: 2, kind: input, shape index: {}]   ;;  %s695_s3 = inlined_call_operand.vmem [shape: f32[8,32], index: 3, kind: input, shape index: {}]   ;;  %s696_s4 = inlined_call_operand.vmem [shape: f32[1,32], index: 4, kind: input, shape index: {}]   ;;  %s697_s5 = inlined_call_operand.hbm [shape: f32[32,32], index: 5, kind: input, shape index: {}]   ;;  %s698_s6 = inlined_call_operand.vmem [shape: f32[1,32], index: 6, kind: input, shape index: {}]   ;;  %s699_s7 = inlined_call_operand.vmem [shape: f32[1,32], index: 7, kind: input, shape index: {}]   ;;  %s700_s8 = inlined_call_operand.<no memory space> [shape: f32[1,1], index: 8, kind: input, shape index: {}]   ;;  %s701_s9 = inlined_call_operand.vmem [shape: f32[8,1], index: 9, kind: output, shape index: {}]  }
   0x1   :  { %v14_v0 = vstv %s700_s8 }
   0x2   :  { %15 = vst [vmem:[#allocation2] sm:$0x1] %v14_v0 }
   0x3   :  { %16 = vsyncpa [#allocation4], 0 }
   0x4   :  { %17 = vsyncpa [#allocation6], 0  ;;  %s558_s11 = smov [#allocation3]   ;;  %s510_s15 = scalar_lea.hbm %s694_s2, 2048 }
   0x5   :  { %s27_s12 = sshll.u32 %s558_s11, 4  ;;  %p511_p0 = scmp.ne.s32.totalorder %s694_s2, %s510_s15  ;;  %s28_s12 = int_to_ptr.vmem [resolvable:$true] %s27_s12 }
   0x6   :  { %p514_p1 = scmp.lt.u32.totalorder %s510_s15, %s694_s2 }
   0x8   :  { %p516_p2 = pnand %p514_p1, %p511_p0 }
   0xa   :  { %519 = shalt.err (!%p516_p2)
}
   0xb   :  { %s520_s8 = scalar_lea.vmem %s28_s12, 2048  ;;  %p525_p4 = scmp.lt.s32.totalorder %s28_s12, %s28_s12 }
   0xc   :  { %p521_p3 = scmp.ne.s32.totalorder %s28_s12, %s520_s8  ;;  %p526_p5 = scmp.lt.s32.totalorder %s520_s8, %s520_s8 }
   0xe   :  { %p527_p6 = por %p526_p5, %p525_p4 }
  0x10   :  { %p528_p7 = pnand %p527_p6, %p521_p3 }
  0x12   :  { %531 = shalt.err (!%p528_p7)
}
  0x13   :  { %s559_s20 = smov 128   ;;  %s560_s21 = smov 8  }
  0x14   :  { %33 = dma.hbm_to_vmem [thread:$0]  %s694_s2, 2048, %s28_s12, [#allocation4], %s559_s20, %s559_s20, %s560_s21  }
  0x15   :  { %s561_s24 = smov [#allocation5]   ;;  %s532_s28 = scalar_lea.hbm %s697_s5, 512 }
  0x16   :  { %s43_s25 = sshll.u32 %s561_s24, 4  ;;  %p533_p8 = scmp.ne.s32.totalorder %s697_s5, %s532_s28  ;;  %s44_s25 = int_to_ptr.vmem [resolvable:$true] %s43_s25 }
  0x17   :  { %p536_p9 = scmp.lt.u32.totalorder %s532_s28, %s697_s5 }
  0x19   :  { %p538_p10 = pnand %p536_p9, %p533_p8 }
  0x1b   :  { %541 = shalt.err (!%p538_p10)
}
  0x1c   :  { %s542_s13 = scalar_lea.vmem %s44_s25, 512  ;;  %p547_p12 = scmp.lt.s32.totalorder %s44_s25, %s44_s25 }
  0x1d   :  { %p543_p11 = scmp.ne.s32.totalorder %s44_s25, %s542_s13  ;;  %p548_p13 = scmp.lt.s32.totalorder %s542_s13, %s542_s13 }
  0x1f   :  { %p549_p0 = por %p548_p13, %p547_p12 }
  0x21   :  { %p550_p1 = pnand %p549_p0, %p543_p11 }
  0x23   :  { %553 = shalt.err (!%p550_p1)
}
  0x24   :  { %49 = dma.hbm_to_vmem [thread:$0]  %s697_s5, 512, %s44_s25, [#allocation6], %s559_s20, %s559_s20, %s560_s21  }
  0x25   :  { %554 = dma.done.wait [#allocation4], 2048  }
  0x26   :  { %555 = vsyncadd [#allocation4], 4294965248 }
  0x27   :  { %556 = dma.done.wait [#allocation6], 512  }
  0x28   :  { %557 = vsyncadd [#allocation6], 4294966784  ;;  %v63_v1 = vlaneseq  ;;  %v562_v2 = vmov 0   ;;  %v563_v3 = vmov 2   ;;  %v564_v5 = vmov 0.0|0.0   ;;  %v62_v8 = vld [vmem:[%s692_s0] sm:$0xff] }
  0x29   :  { %505 = vset.pattern.permute.xlu0 %v562_v2  ;;  %507 = vset.pattern.permute.xlu1 %v563_v3  ;;  %v565_v6 = vmov 0.0   ;;  %v95_v9 = vld [vmem:[#allocation3] sm:$0xff]  ;;  %v96_v10 = vld [vmem:[#allocation3 + $0x8] sm:$0xff]  ;;  %v97_v13 = vld [vmem:[#allocation3 + $0x10] sm:$0xff]  ;;  %v566_v18 = vmov 1   ;;  %v567_v19 = vmov 3  }
  0x2a   :  { %v646_v4 = vand.u32 127, %v63_v1  ;;  %464 = vmatprep.subr.bf16.mxu1 %v564_v5  ;;  %413 = vmatprep.subr.mxu0 %v565_v6  ;;  %v465_v12 = vpack.c.bf16 %v96_v10, %v95_v9  ;;  %v98_v14 = vld [vmem:[#allocation3 + $0x18] sm:$0xff]  ;;  %v99_v16 = vld [vmem:[#allocation3 + $0x20] sm:$0xff]  ;;  %v100_v17 = vld [vmem:[#allocation3 + $0x28] sm:$0xff]  ;;  %vm113_vm0 = vcmask 64512   ;;  %vm568_vm1 = vmmov 0  }
  0x2b   :  { %v468_v15 = vpack.c.bf16 %v98_v14, %v97_v13  ;;  %v471_v20 = vpack.c.bf16 %v100_v17, %v99_v16  ;;  %v101_v21 = vld [vmem:[#allocation3 + $0x30] sm:$0xff]  ;;  %v102_v22 = vld [vmem:[#allocation3 + $0x38] sm:$0xff]  ;;  %v103_v25 = vld [vmem:[#allocation3 + $0x40] sm:$0xff]  ;;  %415 = vmatprep.mubr.msk.f32.mxu0 %vm568_vm1, %v565_v6  ;;  %450 = vmatprep.mubr.msk.f32.mxu1 %vm568_vm1, %v565_v6  ;;  %vm277_vm6 = vcmask 261120   ;;  %vm371_vm7 = vcmask 7168  }
  0x2c   :  { %v65_v7 = vmul.u32 17, %v646_v4  ;;  %466 = vmatpush3.bf16.msra.mxu1 %v465_v12  ;;  %v474_v23 = vpack.c.bf16 %v102_v22, %v101_v21  ;;  %v112_v24 = vld [vmem:[%s695_s3] sm:$0xff]  ;;  %v104_v26 = vld [vmem:[#allocation3 + $0x48] sm:$0xff]  ;;  %v107_v32 = vld [vmem:[#allocation3 + $0x60] sm:$0xff] }
  0x2d   :  { %467 = vmatprep.subr.bf16.mxu1 %v564_v5  ;;  %414 = vmatpush3.msra.mxu0 %v112_v24  ;;  %v111_v27 = vld [vmem:[%s693_s1] sm:$0xff]  ;;  %v477_v28 = vpack.c.bf16 %v104_v26, %v103_v25  ;;  %v108_v33 = vld [vmem:[#allocation3 + $0x68] sm:$0xff]  ;;  %v266_v49 = vld [vmem:[#allocation5] sm:$0xff] }
  0x2e   :  { %v66_v11 = vadd.s32 %v65_v7, %v62_v8  ;;  %416 = vmatmul.mubr.msk.f32.vlgmr.msra.gmra.mrb[0].mxu0 %vm113_vm0, %v111_v27  ;;  %488 = vmatprep.subr.bf16.mxu0 %v564_v5  ;;  %v105_v29 = vld [vmem:[#allocation3 + $0x50] sm:$0xff]  ;;  %v106_v30 = vld [vmem:[#allocation3 + $0x58] sm:$0xff]  ;;  %v483_v34 = vpack.c.bf16 %v108_v33, %v107_v32  ;;  %v267_v50 = vld [vmem:[#allocation5 + $0x8] sm:$0xff] }
  0x2f   :  { %461 = vmatprep.mubr.msk.f32.mxu0 %vm568_vm1, %v565_v6  ;;  %v480_v31 = vpack.c.bf16 %v106_v30, %v105_v29  ;;  %v109_v35 = vld [vmem:[#allocation3 + $0x70] sm:$0xff]  ;;  %v110_v36 = vld [vmem:[#allocation3 + $0x78] sm:$0xff]  ;;  %v489_v51 = vpack.c.bf16 %v267_v50, %v266_v49 }
  0x30   :  { %68 = vperm.xlu0 %505, %v66_v11   ;;  %82 = vperm.xlu1 %507, %v66_v11   ;;  %v486_v37 = vpack.c.bf16 %v110_v36, %v109_v35  ;;  %v268_v54 = vld [vmem:[#allocation5 + $0x10] sm:$0xff]  ;;  %v269_v55 = vld [vmem:[#allocation5 + $0x18] sm:$0xff] }
  0x31   :  { %469 = vmatpush3.bf16.msra.mxu1 %v468_v15  ;;  %490 = vmatpush3.bf16.msra.mxu0 %v489_v51  ;;  %v492_v56 = vpack.c.bf16 %v269_v55, %v268_v54  ;;  %v384_v58 = vld [vmem:[%s696_s4] ss:$0 sm:$0xff]  ;;  %v388_v7 = vld [vmem:[#allocation2] ss:$0 sm:$0xff] }
  0x32   :  { %470 = vmatprep.subr.bf16.mxu1 %v564_v5  ;;  %491 = vmatprep.subr.bf16.mxu0 %v564_v5  ;;  %v385_v63 = vld [vmem:[%s698_s6] ss:$0 sm:$0xff] }
  0x33   :  { %v387_v3 = vld [vmem:[%s699_s7] ss:$0 sm:$0xff] }
  0x34   :  { %506 = vset.pattern.permute.xlu0 %v566_v18  ;;  %508 = vset.pattern.permute.xlu1 %v567_v19 }
  0x35   :  { %75 = vperm.xlu0 %506, %v66_v11   ;;  %89 = vperm.xlu1 %508, %v66_v11  }
  0x36   :  { %472 = vmatpush3.bf16.msra.mxu1 %v471_v20  ;;  %493 = vmatpush3.bf16.msra.mxu0 %v492_v56 }
  0x37   :  { %473 = vmatprep.subr.bf16.mxu1 %v564_v5 }
  0x39   :  { %509 = vset.pattern.permute.xlu0 %v567_v19 }
  0x3a   :  { %475 = vmatpush3.bf16.msra.mxu1 %v474_v23 }
  0x3b   :  { %476 = vmatprep.subr.bf16.mxu1 %v564_v5 }
  0x3e   :  { %478 = vmatpush3.bf16.msra.mxu1 %v477_v28 }
  0x3f   :  { %479 = vmatprep.subr.bf16.mxu1 %v564_v5 }
  0x42   :  { %481 = vmatpush3.bf16.msra.mxu1 %v480_v31 }
  0x43   :  { %482 = vmatprep.subr.bf16.mxu1 %v564_v5 }
  0x46   :  { %484 = vmatpush3.bf16.msra.mxu1 %v483_v34 }
  0x47   :  { %485 = vmatprep.subr.bf16.mxu1 %v564_v5 }
  0x4a   :  { %487 = vmatpush3.bf16.msra.mxu1 %v486_v37 }
  0xaf   :  { %v69_v38 = vpop.permute.xlu0 %68  ;;  %v83_v39 = vpop.permute.xlu1 %82 }
  0xb0   :  { %vm70_vm2 = vcmp.eq.s32.totalorder %v69_v38, %v646_v4  ;;  %vm84_vm3 = vcmp.eq.s32.totalorder %v83_v39, %v646_v4 }
  0xb1   :  { %v379_v42 = vsel %vm70_vm2, 1.0, %v565_v6  ;;  %v381_v45 = vsel %vm84_vm3, 1.0, %v565_v6 }
  0xb4   :  { %v76_v40 = vpop.permute.xlu0 %75  ;;  %v90_v41 = vpop.permute.xlu1 %89 }
  0xb5   :  { %vm77_vm4 = vcmp.eq.s32.totalorder %v76_v40, %v646_v4  ;;  %vm91_vm5 = vcmp.eq.s32.totalorder %v90_v41, %v646_v4 }
  0xb6   :  { %v380_v43 = vsel %vm77_vm4, 1.0, %v565_v6  ;;  %v382_v46 = vsel %vm91_vm5, 1.0, %v565_v6 }
  0xb7   :  { %v80_v44 = vadd.f32 %v380_v43, %v379_v42 }
  0xb9   :  { %v87_v47 = vadd.f32 %v381_v45, %v80_v44 }
  0xbb   :  { %v94_v48 = vadd.f32 %v382_v46, %v87_v47 }
  0xbd   :  { %451 = vmatmul.mubr.f32.vlgmr.msra.gmra.mrb[0].mxu1 %v94_v48 }
 0x101   :  { %v183_v52 = vpop.f32.mrb[0].mxu0 }
 0x102   :  { %v417_v53 = vpop.f32.mrb[1].mxu0 }
 0x190   :  { %v253_v57 = vpop.f32.mrb[0].mxu1 }
 0x191   :  { %v254_v59 = vadd.f32 %v253_v57, %v183_v52  ;;  %v452_v60 = vpop.f32.mrb[1].mxu1 }
 0x193   :  { %v264_v61 = vadd.f32 %v384_v58, %v254_v59 }
 0x195   :  { %v265_v62 = vmax.f32 %v264_v61, 0.0 }
 0x197   :  { %462 = vmatmul.mubr.msk.f32.vlgmr.msra.gmra.mrb[2].mxu0 %vm277_vm6, %v265_v62 }
 0x26a   :  { %v347_v0 = vpop.f32.mrb[2].mxu0 }
 0x26b   :  { %v348_v1 = vadd.f32 %v385_v63, %v347_v0  ;;  %v463_v2 = vpop.f32.mrb[3].mxu0 }
 0x26d   :  { %v351_v4 = vmax.f32 %v348_v1, 0.0 }
 0x26f   :  { %v359_v5 = vmul.f32 %v387_v3, %v351_v4 }
 0x271   :  { %v360_v6 = vsel %vm277_vm6, %v359_v5, 0.0 }
 0x272   :  { %361 = vadd.xlane.f32.xlu1 %v360_v6 }
 0x2ff   :  { %v362_v8 = vpop.xlane.xlu1 %361 }
 0x300   :  { %v370_v9 = vadd.f32 %v388_v7, %v362_v8 }
 0x302   :  { %372 = vst.msk [vmem:[%s701_s9] sm:$0xff] %vm371_vm7, %v370_v9 }
 0x303   :  { %377 = vsyncpa [#allocation4], 1 }
 0x304   :  { %378 = vsyncpa [#allocation6], 1 }

</bundles_post_ra>
